<compile_context>
chip_gen: v7x
topology: tpu7x:2x2x1
jax: 0.10.0
libtpu: 0.0.40
codegen_flags: <defaults>
</compile_context>

<pallas_src>
import jax
import jax.numpy as jnp
from jax.experimental import pallas as pl
from jax.experimental.pallas import tpu as pltpu  # noqa: F401  (TPU backend)

_SUBLANE = 8


def _sigmoid_kernel(x_ref, o_ref):
    # Compute in f32 regardless of input dtype (exact; v5e has no bf16 EUP).
    x = x_ref[...].astype(jnp.float32)
    y = 0.5 * jnp.tanh(0.5 * x) + 0.5  # exact sigmoid, one EUP transcendental
    o_ref[...] = y.astype(o_ref.dtype)


def sigmoid_pallas(x: jax.Array) -> jax.Array:
    """Elementwise sigmoid matching torch.Tensor.sigmoid() on any tensor."""
    orig_shape = x.shape
    total = x.size

    # Metadata-only reshape to a 2-D slab; prefer 8 sublane rows when possible
    # so every vreg's sublanes are used.  Full-array block => the (8,128)
    # divisibility rule does not apply and no padding is needed.
    rows = _SUBLANE if total % _SUBLANE == 0 else 1
    slab = x.reshape(rows, total // rows)

    out = pl.pallas_call(
        _sigmoid_kernel,
        out_shape=jax.ShapeDtypeStruct(slab.shape, x.dtype),
        in_specs=[pl.BlockSpec(slab.shape, lambda: (0, 0))],
        out_specs=pl.BlockSpec(slab.shape, lambda: (0, 0)),
    )(slab)

    return out.reshape(orig_shape)


if __name__ == "__main__":
    key = jax.random.PRNGKey(0)
    # Shape implied by the module: torch.Size([1, 1344, 1, 1]) in NCHW.
    x480 = jax.random.normal(key, (1, 1344, 1, 1), dtype=jnp.float32)

    x481 = jax.jit(sigmoid_pallas)(x480)
    jax.block_until_ready(x481)

    # Exact-path check against plain JAX sigmoid.
    ref = jax.nn.sigmoid(x480)
    assert x481.shape == x480.shape
    assert x481.dtype == x480.dtype
    max_err = float(jnp.max(jnp.abs(x481 - ref)))
    assert max_err < 1e-6, f"max abs error {max_err}"

    print("KERNEL_OK")
</pallas_src>

<mosaic_0001>
module attributes {stable_mosaic.version = 11 : i64} {
  func.func @_sigmoid_kernel(%arg0: memref<8x168xf32, #tpu.memory_space<vmem>>, %arg1: memref<8x168xf32, #tpu.memory_space<vmem>>) attributes {dimension_semantics = [], scalar_prefetch = 0 : i64, scratch_operands = 0 : i64, tpu.core_type = #tpu.core_type<tc>} {
    %c0 = arith.constant 0 : index
    %c0_0 = arith.constant 0 : index
    %0 = vector.load %arg0[%c0, %c0_0] : memref<8x168xf32, #tpu.memory_space<vmem>>, vector<8x168xf32>
    %cst = arith.constant 5.000000e-01 : f32
    %1 = vector.broadcast %cst : f32 to vector<8x168xf32>
    %2 = arith.mulf %1, %0 : vector<8x168xf32>
    %3 = math.tanh %2 : vector<8x168xf32>
    %cst_1 = arith.constant 5.000000e-01 : f32
    %4 = vector.broadcast %cst_1 : f32 to vector<8x168xf32>
    %5 = arith.mulf %4, %3 : vector<8x168xf32>
    %cst_2 = arith.constant 5.000000e-01 : f32
    %6 = vector.broadcast %cst_2 : f32 to vector<8x168xf32>
    %7 = arith.addf %5, %6 : vector<8x168xf32>
    %c0_3 = arith.constant 0 : index
    %c0_4 = arith.constant 0 : index
    %8 = vector.load %arg1[%c0_3, %c0_4] : memref<8x168xf32, #tpu.memory_space<vmem>>, vector<8x168xf32>
    tpu.vector_store %arg1[%c0_3, %c0_4], %7 {strides = array<i32>} : memref<8x168xf32, #tpu.memory_space<vmem>>, vector<8x168xf32>,
    return
  }
}

</mosaic_0001>

<bundles_post_ra>
// kernel: sigmoid_pallas.1
= control target key start
LH: loop header
LB: loop body
LE: loop exit
PB: predicated region body
PF: predicated region fallthrough
CT: control target
= control target key end

     0   :  { %vm19_vm0 = vcmask 326656   ;;  %s51_s0 = inlined_call_operand.vmem [shape: f32[8,168], index: 0, kind: input, shape index: {}]   ;;  %s52_s1 = inlined_call_operand.vmem [shape: f32[8,168], index: 1, kind: output, shape index: {}]  }
   0x1   :  { %v8_v0 = vld [vmem:[%s51_s0] sm:$0xff]  ;;  %v9_v1 = vld [vmem:[%s51_s0 + $0x8] sm:$0xff] }
   0x2   :  { %v10_v2 = vmul.f32 0.5, %v8_v0  ;;  %v11_v3 = vmul.f32 0.5, %v9_v1 }
   0x4   :  { %25 = vtanh.f32 %v10_v2 }
   0x5   :  { %27 = vtanh.f32 %v11_v3 }
   0xe   :  { %v26_v4 = vpop.eup %25 }
   0xf   :  { %v28_v5 = vpop.eup %27  ;;  %v14_v6 = vmul.f32 0.5, %v26_v4 }
  0x10   :  { %v15_v7 = vmul.f32 0.5, %v28_v5 }
  0x11   :  { %v16_v8 = vadd.f32 0.5, %v14_v6 }
  0x12   :  { %v17_v9 = vadd.f32 0.5, %v15_v7 }
  0x13   :  { %18 = vst [vmem:[%s52_s1] sm:$0xff] %v16_v8 }
  0x14   :  { %20 = vst.msk [vmem:[%s52_s1 + $0x8] sm:$0xff] %vm19_vm0, %v17_v9 }

</bundles_post_ra>
